<compile_context>
chip_gen: v7x
topology: tpu7x:2x2x1
jax: 0.10.0
libtpu: 0.0.40
codegen_flags: <defaults>
</compile_context>

<pallas_src>
import math

import jax
import jax.numpy as jnp
from jax.experimental import pallas as pl
from jax.experimental.pallas import tpu as pltpu


def _sdecoder_kernel(xz_ref, p_ref, out_ref):
    # xz_ref : (C+L, T)  rows 0..C-1 = coords, rows C..C+L-1 = z (per-lane)
    # p_ref  : (H, C+L+2H+5) packed [wc | wl | w1 | w2 | wo^T | bc | b1 | b2 | bo]
    # out_ref: (1, T) lane-dense output row
    cl = xz_ref.shape[0]
    hdim = p_ref.shape[0]
    o_w1 = cl
    o_w2 = cl + hdim
    o_wo = cl + 2 * hdim
    o_bc = o_wo + 1
    o_b1 = o_bc + 1
    o_b2 = o_b1 + 1
    o_bo = o_b2 + 1

    xz = xz_ref[...]                                        # (C+L, T)

    # --- coord_latent fused: h = tanh(bc + Wc@xc + Wl@z) --------------------
    # C+L broadcast FMAs on the VPU (K=2/3 is degenerate for the MXU).
    h = p_ref[:, o_bc:o_bc + 1]                             # (H, 1) bias column
    for c in range(cl):
        h = h + p_ref[:, c:c + 1] * xz[c:c + 1, :]          # (H,1)x(1,T) outer FMA
    h = jnp.tanh(h)                                         # (H, T), lane-dense

    # --- fc_layers: 2 x (Linear(H, H) + tanh), computed as W @ h (MXU) ------
    h = jnp.tanh(jnp.dot(p_ref[:, o_w1:o_w2], h,
                         preferred_element_type=jnp.float32)
                 + p_ref[:, o_b1:o_b1 + 1])
    h = jnp.tanh(jnp.dot(p_ref[:, o_w2:o_wo], h,
                         preferred_element_type=jnp.float32)
                 + p_ref[:, o_b2:o_b2 + 1])

    # --- output head: Linear(H, 1) + sigmoid, kept OFF the MXU --------------
    # (M=1 wastes the MXU result rows; VPU multiply + sublane/XLU reduce.)
    o = jnp.sum(p_ref[:, o_wo:o_wo + 1] * h, axis=0, keepdims=True)   # (1, T)
    o = o + p_ref[0:1, o_bo:o_bo + 1]
    out_ref[...] = jax.nn.sigmoid(o).astype(out_ref.dtype)


def _choose_lane_tiling(lanes):
    """Single grid step on single-TC chips; >=2 parallel lane tiles on v7x
    (2 TensorCores) or when the slab outgrows ~2048 lanes."""
    ncores = 1
    try:
        kind = jax.devices()[0].device_kind.lower()
        if "v7" in kind:
            ncores = 2
    except Exception:
        pass
    if lanes % 128 != 0:
        return 1, lanes                       # full-array block (masked store fallback)
    tiles = max(ncores, pl.cdiv(lanes, 2048))
    if lanes % (tiles * 128) != 0:
        return 1, lanes
    return tiles, lanes // tiles


def sdecoder_forward(x_coord, z, params, out_dim):
    """x_coord: (B, N, C), z: (B, L). Returns (B, *out_dim)."""
    B, N, C = x_coord.shape
    L = z.shape[-1]
    H = params["w1"].shape[0]
    lanes = B * N

    # --- layout plumbing only (no compute moved out of the kernel) ----------
    # Coords + per-batch-segment z stacked into one lane-dense (C+L, B*N) slab.
    x_t = jnp.transpose(x_coord, (2, 0, 1)).reshape(C, lanes)       # (C, B*N)
    z_t = jnp.repeat(z.T, N, axis=1)                                # (L, B*N)
    xz = jnp.concatenate([x_t, z_t], axis=0).astype(jnp.float32)    # (C+L, B*N)

    # One packed parameter slab -> a single small DMA instead of 9.
    p_slab = jnp.concatenate(
        [params["wc"], params["wl"], params["w1"], params["w2"],
         params["wo"].T, params["bc"], params["b1"], params["b2"],
         jnp.broadcast_to(params["bo"], (H, 1))],
        axis=1).astype(jnp.float32)                                 # (H, C+L+2H+5)

    num_tiles, tile = _choose_lane_tiling(lanes)

    out = pl.pallas_call(
        _sdecoder_kernel,
        out_shape=jax.ShapeDtypeStruct((1, lanes), jnp.float32),
        grid=(num_tiles,),
        in_specs=[
            pl.BlockSpec((C + L, tile), lambda t: (0, t)),          # activation slab
            pl.BlockSpec(p_slab.shape, lambda t: (0, 0)),           # params, resident
        ],
        out_specs=pl.BlockSpec((1, tile), lambda t: (0, t)),
        compiler_params=pltpu.CompilerParams(dimension_semantics=("parallel",)),
    )(xz, p_slab)

    return out.reshape((-1,) + tuple(out_dim))


def init_params(key, coord_dim, latent_dim, hidden_dim):
    """PyTorch nn.Linear-style init (uniform +/- 1/sqrt(fan_in)).
    Weights stored PyTorch-native (out_features, in_features); biases as
    (out_features, 1) columns for the transposed datapath."""
    ks = jax.random.split(key, 9)

    def lin_w(k, fan_in, fan_out):
        bound = 1.0 / math.sqrt(fan_in)
        return jax.random.uniform(k, (fan_out, fan_in), jnp.float32, -bound, bound)

    def lin_b(k, fan_in, fan_out):
        bound = 1.0 / math.sqrt(fan_in)
        return jax.random.uniform(k, (fan_out, 1), jnp.float32, -bound, bound)

    return {
        "wc": lin_w(ks[0], coord_dim, hidden_dim),
        "bc": lin_b(ks[1], coord_dim, hidden_dim),
        "wl": lin_w(ks[2], latent_dim, hidden_dim),     # fc_latent has no bias
        "w1": lin_w(ks[3], hidden_dim, hidden_dim),
        "b1": lin_b(ks[4], hidden_dim, hidden_dim),
        "w2": lin_w(ks[5], hidden_dim, hidden_dim),
        "b2": lin_b(ks[6], hidden_dim, hidden_dim),
        "wo": lin_w(ks[7], hidden_dim, 1),
        "bo": lin_b(ks[8], hidden_dim, 1),
    }


def sdecoder_reference(x_coord, z, params, out_dim):
    """Pure-JAX reference mirroring the PyTorch forward exactly."""
    B, N, C = x_coord.shape
    xc = x_coord.reshape(B * N, C)
    h_x = xc @ params["wc"].T + params["bc"][:, 0]
    h_x = h_x.reshape(B, N, -1)
    h_z = z @ params["wl"].T
    h = jnp.tanh(h_x + h_z[:, None, :])
    h = h.reshape(B * N, -1)
    h = jnp.tanh(h @ params["w1"].T + params["b1"][:, 0])
    h = jnp.tanh(h @ params["w2"].T + params["b2"][:, 0])
    o = jax.nn.sigmoid(h @ params["wo"].T + params["bo"][:, 0])
    return o.reshape((-1,) + tuple(out_dim))


if __name__ == "__main__":
    # Module config: sDecoderNet(out_dim=(16,16), latent_dim=3, hidden_dim=32,
    #                            num_layers=2, activation='tanh', sigmoid_out=True)
    out_dim = (16, 16)
    H_img, W_img = out_dim
    coord_dim = 2                     # len(out_dim) >= 2 -> 2-D coordinates
    latent_dim = 3
    hidden_dim = 32
    batch = 2
    n = H_img * W_img                 # 256 coordinate points per image

    key = jax.random.PRNGKey(0)
    k_par, k_z = jax.random.split(key)

    # Coordinate grid (same grid for every batch item, as in trVAE usage).
    yy, xx = jnp.meshgrid(
        jnp.linspace(-1.0, 1.0, H_img), jnp.linspace(-1.0, 1.0, W_img), indexing="ij"
    )
    grid_pts = jnp.stack([yy.ravel(), xx.ravel()], axis=-1)          # (n, 2)
    x_coord = jnp.broadcast_to(grid_pts, (batch, n, coord_dim)).astype(jnp.float32)

    # z is a single tensor -> Concat() is the identity.
    # TODO(synk): multi-tensor z (list input to Concat with broadcasting) is
    # handled outside the kernel and not exercised here.
    z = jax.random.normal(k_z, (batch, latent_dim), jnp.float32)

    params = init_params(k_par, coord_dim, latent_dim, hidden_dim)

    out = sdecoder_forward(x_coord, z, params, out_dim)
    out = jax.block_until_ready(out)

    ref = sdecoder_reference(x_coord, z, params, out_dim)
    assert out.shape == (batch, H_img, W_img), out.shape
    assert jnp.allclose(out, ref, atol=1e-5, rtol=1e-5), float(jnp.max(jnp.abs(out - ref)))

    print("KERNEL_OK")
</pallas_src>

<mosaic_0001>
module attributes {stable_mosaic.version = 11 : i64} {
  func.func @_sdecoder_kernel(%arg0: i32, %arg1: memref<5x512xf32, #tpu.memory_space<vmem>>, %arg2: memref<32x74xf32, #tpu.memory_space<vmem>>, %arg3: memref<1x512xf32, #tpu.memory_space<vmem>>) attributes {dimension_semantics = [#tpu.dimension_semantics<parallel>], iteration_bounds = array<i64: 1>, scalar_prefetch = 0 : i64, scratch_operands = 0 : i64, tpu.core_type = #tpu.core_type<tc>, window_params = [{transform_indices = @transform_0, window_bounds = array<i64: 5, 512>}, {pipeline_mode = #tpu.pipeline_mode<synchronous>, transform_indices = @transform_1, window_bounds = array<i64: 32, 74>}, {transform_indices = @transform_2, window_bounds = array<i64: 1, 512>}]} {
    %c0 = arith.constant 0 : index
    %c0_0 = arith.constant 0 : index
    %0 = vector.load %arg1[%c0, %c0_0] : memref<5x512xf32, #tpu.memory_space<vmem>>, vector<5x512xf32>
    %c0_1 = arith.constant 0 : index
    %c70 = arith.constant 70 : index
    %1 = vector.load %arg2[%c0_1, %c70] : memref<32x74xf32, #tpu.memory_space<vmem>>, vector<32x1xf32>
    %c0_2 = arith.constant 0 : index
    %c0_3 = arith.constant 0 : index
    %2 = vector.load %arg2[%c0_2, %c0_3] : memref<32x74xf32, #tpu.memory_space<vmem>>, vector<32x1xf32>
    %3 = vector.extract_strided_slice %0 {offsets = [0, 0], sizes = [1, 512], strides = [1, 1]} : vector<5x512xf32> to vector<1x512xf32>
    %4 = vector.broadcast %2 : vector<32x1xf32> to vector<32x512xf32>
    %5 = vector.broadcast %3 : vector<1x512xf32> to vector<32x512xf32>
    %6 = arith.mulf %4, %5 : vector<32x512xf32>
    %7 = vector.broadcast %1 : vector<32x1xf32> to vector<32x512xf32>
    %8 = arith.addf %7, %6 : vector<32x512xf32>
    %c0_4 = arith.constant 0 : index
    %c1 = arith.constant 1 : index
    %9 = vector.load %arg2[%c0_4, %c1] : memref<32x74xf32, #tpu.memory_space<vmem>>, vector<32x1xf32>
    %10 = vector.extract_strided_slice %0 {offsets = [1, 0], sizes = [1, 512], strides = [1, 1]} : vector<5x512xf32> to vector<1x512xf32>
    %11 = vector.broadcast %9 : vector<32x1xf32> to vector<32x512xf32>
    %12 = vector.broadcast %10 : vector<1x512xf32> to vector<32x512xf32>
    %13 = arith.mulf %11, %12 : vector<32x512xf32>
    %14 = arith.addf %8, %13 : vector<32x512xf32>
    %c0_5 = arith.constant 0 : index
    %c2 = arith.constant 2 : index
    %15 = vector.load %arg2[%c0_5, %c2] : memref<32x74xf32, #tpu.memory_space<vmem>>, vector<32x1xf32>
    %16 = vector.extract_strided_slice %0 {offsets = [2, 0], sizes = [1, 512], strides = [1, 1]} : vector<5x512xf32> to vector<1x512xf32>
    %17 = vector.broadcast %15 : vector<32x1xf32> to vector<32x512xf32>
    %18 = vector.broadcast %16 : vector<1x512xf32> to vector<32x512xf32>
    %19 = arith.mulf %17, %18 : vector<32x512xf32>
    %20 = arith.addf %14, %19 : vector<32x512xf32>
    %c0_6 = arith.constant 0 : index
    %c3 = arith.constant 3 : index
    %21 = vector.load %arg2[%c0_6, %c3] : memref<32x74xf32, #tpu.memory_space<vmem>>, vector<32x1xf32>
    %22 = vector.extract_strided_slice %0 {offsets = [3, 0], sizes = [1, 512], strides = [1, 1]} : vector<5x512xf32> to vector<1x512xf32>
    %23 = vector.broadcast %21 : vector<32x1xf32> to vector<32x512xf32>
    %24 = vector.broadcast %22 : vector<1x512xf32> to vector<32x512xf32>
    %25 = arith.mulf %23, %24 : vector<32x512xf32>
    %26 = arith.addf %20, %25 : vector<32x512xf32>
    %c0_7 = arith.constant 0 : index
    %c4 = arith.constant 4 : index
    %27 = vector.load %arg2[%c0_7, %c4] : memref<32x74xf32, #tpu.memory_space<vmem>>, vector<32x1xf32>
    %28 = vector.extract_strided_slice %0 {offsets = [4, 0], sizes = [1, 512], strides = [1, 1]} : vector<5x512xf32> to vector<1x512xf32>
    %29 = vector.broadcast %27 : vector<32x1xf32> to vector<32x512xf32>
    %30 = vector.broadcast %28 : vector<1x512xf32> to vector<32x512xf32>
    %31 = arith.mulf %29, %30 : vector<32x512xf32>
    %32 = arith.addf %26, %31 : vector<32x512xf32>
    %33 = math.tanh %32 : vector<32x512xf32>
    %c0_8 = arith.constant 0 : index
    %c5 = arith.constant 5 : index
    %34 = vector.load %arg2[%c0_8, %c5] : memref<32x74xf32, #tpu.memory_space<vmem>>, vector<32x32xf32>
    %cst = arith.constant dense<0.000000e+00> : vector<32x512xf32>
    %35 = tpu.matmul %34, %33, %cst {dimension_numbers = #tpu.dot_dimension_numbers<[1], [0], [0], [1], [0, 0, 1, 1], [], []>} : vector<32x32xf32>, vector<32x512xf32>, vector<32x512xf32> -> vector<32x512xf32>
    %c0_9 = arith.constant 0 : index
    %c71 = arith.constant 71 : index
    %36 = vector.load %arg2[%c0_9, %c71] : memref<32x74xf32, #tpu.memory_space<vmem>>, vector<32x1xf32>
    %37 = vector.broadcast %36 : vector<32x1xf32> to vector<32x512xf32>
    %38 = arith.addf %35, %37 : vector<32x512xf32>
    %39 = math.tanh %38 : vector<32x512xf32>
    %c0_10 = arith.constant 0 : index
    %c37 = arith.constant 37 : index
    %40 = vector.load %arg2[%c0_10, %c37] : memref<32x74xf32, #tpu.memory_space<vmem>>, vector<32x32xf32>
    %cst_11 = arith.constant dense<0.000000e+00> : vector<32x512xf32>
    %41 = tpu.matmul %40, %39, %cst_11 {dimension_numbers = #tpu.dot_dimension_numbers<[1], [0], [0], [1], [0, 0, 1, 1], [], []>} : vector<32x32xf32>, vector<32x512xf32>, vector<32x512xf32> -> vector<32x512xf32>
    %c0_12 = arith.constant 0 : index
    %c72 = arith.constant 72 : index
    %42 = vector.load %arg2[%c0_12, %c72] : memref<32x74xf32, #tpu.memory_space<vmem>>, vector<32x1xf32>
    %43 = vector.broadcast %42 : vector<32x1xf32> to vector<32x512xf32>
    %44 = arith.addf %41, %43 : vector<32x512xf32>
    %45 = math.tanh %44 : vector<32x512xf32>
    %c0_13 = arith.constant 0 : index
    %c69 = arith.constant 69 : index
    %46 = vector.load %arg2[%c0_13, %c69] : memref<32x74xf32, #tpu.memory_space<vmem>>, vector<32x1xf32>
    %47 = vector.broadcast %46 : vector<32x1xf32> to vector<32x512xf32>
    %48 = arith.mulf %47, %45 : vector<32x512xf32>
    %cst_14 = arith.constant dense<0.000000e+00> : vector<512xf32>
    %49 = vector.multi_reduction <add>, %48, %cst_14 [0] : vector<32x512xf32> to vector<512xf32>
    %50 = vector.shape_cast %49 : vector<512xf32> to vector<1x512xf32>
    %c0_15 = arith.constant 0 : index
    %c73 = arith.constant 73 : index
    %51 = vector.load %arg2[%c0_15, %c73] : memref<32x74xf32, #tpu.memory_space<vmem>>, vector<1x1xf32>
    %52 = vector.broadcast %51 : vector<1x1xf32> to vector<1x512xf32>
    %53 = arith.addf %50, %52 : vector<1x512xf32>
    %54 = arith.negf %53 : vector<1x512xf32>
    %55 = math.exp %54 : vector<1x512xf32>
    %cst_16 = arith.constant 1.000000e+00 : f32
    %56 = vector.broadcast %cst_16 : f32 to vector<1x512xf32>
    %57 = arith.addf %56, %55 : vector<1x512xf32>
    %58 = arith.divf %56, %57 : vector<1x512xf32>
    %c0_17 = arith.constant 0 : index
    %c0_18 = arith.constant 0 : index
    %59 = vector.load %arg3[%c0_17, %c0_18] : memref<1x512xf32, #tpu.memory_space<vmem>>, vector<1x512xf32>
    tpu.vector_store %arg3[%c0_17, %c0_18], %58 {strides = array<i32>} : memref<1x512xf32, #tpu.memory_space<vmem>>, vector<1x512xf32>,
    return
  }
  func.func @transform_0(%arg0: i32) -> (i32, i32) {
    %c0_i32 = arith.constant 0 : i32
    %c0_i32_0 = arith.constant 0 : i32
    return %c0_i32, %arg0 : i32, i32
  }
  func.func @transform_1(%arg0: i32) -> (i32, i32) {
    %c0_i32 = arith.constant 0 : i32
    %c0_i32_0 = arith.constant 0 : i32
    %c0_i32_1 = arith.constant 0 : i32
    return %c0_i32, %c0_i32_0 : i32, i32
  }
  func.func @transform_2(%arg0: i32) -> (i32, i32) {
    %c0_i32 = arith.constant 0 : i32
    %c0_i32_0 = arith.constant 0 : i32
    return %c0_i32, %arg0 : i32, i32
  }
}

</mosaic_0001>

<bundles_post_ra>
// kernel: tpu_custom_call.1
= control target key start
LH: loop header
LB: loop body
LE: loop exit
PB: predicated region body
PF: predicated region fallthrough
CT: control target
= control target key end

     0   :  { %7 = vsyncpa [#allocation3], 0  ;;  %s1610_s0 = inlined_call_operand.hbm [shape: f32[5,512], index: 0, kind: input, shape index: {}]   ;;  %s1611_s1 = inlined_call_operand.hbm [shape: f32[32,74], index: 1, kind: input, shape index: {}]   ;;  %s1612_s2 = inlined_call_operand.hbm [shape: f32[1,512], index: 2, kind: output, shape index: {}]  }
   0x1   :  { %8 = vsyncpa [#allocation6], 0 }
   0x2   :  { %9 = vsyncpa [#allocation4], 0  ;;  %s1286_s9 = smov [#allocation2]   ;;  %s1287_s11 = smov [#allocation5]  }
   0x3   :  { %s16_s10 = sshll.u32 %s1286_s9, 4  ;;  %s25_s12 = sshll.u32 %s1287_s11, 4  ;;  %s17_s10 = int_to_ptr.vmem [resolvable:$true] %s16_s10  ;;  %s1320_s12 = int_to_ptr.vmem [resolvable:$true] %s25_s12 }
   0x4   :  { %s1214_s15 = scalar_lea.hbm %s1610_s0, 512 }
   0x5   :  { %p1215_p0 = scmp.ne.s32.totalorder %s1610_s0, %s1214_s15  ;;  %p1218_p1 = scmp.lt.u32.totalorder %s1214_s15, %s1610_s0 }
   0x7   :  { %p1220_p2 = pnand %p1218_p1, %p1215_p0 }
   0x9   :  { %1223 = shalt.err (!%p1220_p2)
}
   0xa   :  { %s1224_s20 = scalar_lea.vmem %s17_s10, 512  ;;  %p1229_p4 = scmp.lt.s32.totalorder %s17_s10, %s17_s10 }
   0xb   :  { %p1225_p3 = scmp.ne.s32.totalorder %s17_s10, %s1224_s20  ;;  %p1230_p5 = scmp.lt.s32.totalorder %s1224_s20, %s1224_s20 }
   0xd   :  { %p1231_p6 = por %p1230_p5, %p1229_p4 }
   0xf   :  { %p1232_p7 = pnand %p1231_p6, %p1225_p3 }
  0x11   :  { %1235 = shalt.err (!%p1232_p7)
}
  0x12   :  { %19 = dma.hbm_to_vmem [thread:$0]  %s1610_s0, 512, %s17_s10, [#allocation3]  }
  0x13   :  { %s1236_s25 = scalar_lea.hbm %s1611_s1, 512 }
  0x14   :  { %p1237_p8 = scmp.ne.s32.totalorder %s1611_s1, %s1236_s25  ;;  %p1240_p9 = scmp.lt.u32.totalorder %s1236_s25, %s1611_s1 }
  0x16   :  { %p1242_p10 = pnand %p1240_p9, %p1237_p8 }
  0x18   :  { %1245 = shalt.err (!%p1242_p10)
}
  0x19   :  { %s1246_s30 = scalar_lea.vmem %s1320_s12, 512  ;;  %p1251_p12 = scmp.lt.s32.totalorder %s1320_s12, %s1320_s12 }
  0x1a   :  { %p1247_p11 = scmp.ne.s32.totalorder %s1320_s12, %s1246_s30  ;;  %p1252_p13 = scmp.lt.s32.totalorder %s1246_s30, %s1246_s30 }
  0x1c   :  { %p1253_p0 = por %p1252_p13, %p1251_p12 }
  0x1e   :  { %p1254_p1 = pnand %p1253_p0, %p1247_p11 }
  0x20   :  { %1257 = shalt.err (!%p1254_p1)
}
  0x21   :  { %s1288_s0 = smov 128   ;;  %s1289_s3 = smov 8  }
  0x22   :  { %31 = dma.hbm_to_vmem [thread:$0]  %s1611_s1, 512, %s1320_s12, [#allocation6], %s1288_s0, %s1288_s0, %s1289_s3  }
  0x23   :  { %1280 = dma.done.wait [#allocation3], 512  }
  0x24   :  { %1281 = vsyncadd [#allocation3], 4294966784 }
  0x25   :  { %1282 = dma.done.wait [#allocation6], 512  }
  0x26   :  { %1283 = vsyncadd [#allocation6], 4294966784  ;;  %v1290_v0 = vmov 70   ;;  %v1291_v1 = vmov 0   ;;  %v1351_v2 = vld [vmem:[#allocation5] sm:$0xff]  ;;  %v1355_v3 = vld [vmem:[#allocation5 + $0x8] sm:$0xff]  ;;  %v1613_v15 = vlaneseq }
  0x27   :  { %1079 = vset.pattern.permute.xlu1 %v1290_v0  ;;  %1078 = vset.pattern.permute.xlu0 %v1291_v1  ;;  %1625 = vst [vmem:[#allocation11_spill] sm:$0xff] %v1351_v2  ;;  %1626 = vst [vmem:[#allocation12_spill] sm:$0xff] %v1355_v3  ;;  %v1359_v4 = vld [vmem:[#allocation5 + $0x18] sm:$0xff]  ;;  %v1292_v5 = vmov 1   ;;  %v1363_v6 = vld [vmem:[#allocation5 + $0x10] sm:$0xff]  ;;  %v1293_v7 = vmov 2  }
  0x28   :  { %99 = vperm.xlu1 %1079, %v1351_v2   ;;  %48 = vperm.xlu0 %1078, %v1351_v2   ;;  %1627 = vst [vmem:[#allocation13_spill] sm:$0xff] %v1359_v4  ;;  %1628 = vst [vmem:[#allocation14_spill] sm:$0xff] %v1363_v6  ;;  %v1294_v8 = vmov 4   ;;  %v1295_v9 = vmov 3   ;;  %s1296_s1 = smov 123   ;;  %v1614_v10 = vmov 0.0  }
  0x29   :  { %499 = vmatprep.mubr.f32.mxu0 %v1614_v10  ;;  %588 = vmatprep.mubr.f32.mxu1 %v1614_v10  ;;  %v1298_v11 = vmov 71   ;;  %s1299_s6 = smov 91   ;;  %v1400_v17 = vshrl.u32 %v1613_v15, 7  ;;  %v38_v22 = vld [vmem:[#allocation2] sm:$0x1f]  ;;  %vm426_vm0 = vcmask 261120  }
  0x2a   :  { %v39_v23 = vld [vmem:[#allocation2 + $0x8] sm:$0x1f]  ;;  %v40_v24 = vld [vmem:[#allocation2 + $0x10] sm:$0x1f]  ;;  %v41_v25 = vld [vmem:[#allocation2 + $0x18] sm:$0x1f] }
  0x2b   :  { %1629 = vst [vmem:[#allocation15_spill] sm:$0xff] %v1400_v17  ;;  %v68_v20 = vsub.s32 0, %v1400_v17  ;;  %v148_v26 = vsub.s32 1, %v1400_v17  ;;  %v212_v27 = vsub.s32 2, %v1400_v17  ;;  %v276_v33 = vsub.s32 3, %v1400_v17  ;;  %s1304_s7 = smov [#allocation7]  }
  0x2c   :  { %103 = vperm.xlu1 %1079, %v1355_v3   ;;  %53 = vperm.xlu0 %1078, %v1355_v3   ;;  %v340_v41 = vsub.s32 4, %v1400_v17  ;;  %s997_s8 = sshll.u32 %s1304_s7, 4  ;;  %s998_s8 = int_to_ptr.vmem [resolvable:$true] %s997_s8 }
  0x2d   :  { %v69_v29 = vrot.slane %v38_v22, %v68_v20  ;;  %v73_v30 = vrot.slane %v39_v23, %v68_v20  ;;  %v77_v31 = vrot.slane %v40_v24, %v68_v20  ;;  %v81_v32 = vrot.slane %v41_v25, %v68_v20  ;;  %s1258_s9 = scalar_lea.vmem %s998_s8, 64  ;;  %p1263_p3 = scmp.lt.s32.totalorder %s998_s8, %s998_s8 }
  0x2e   :  { %v1410_v34 = vrot.slane %v38_v22, %v148_v26  ;;  %v1412_v35 = vrot.slane %v39_v23, %v148_v26  ;;  %v1416_v37 = vrot.slane %v40_v24, %v148_v26  ;;  %v1418_v38 = vrot.slane %v41_v25, %v148_v26  ;;  %p1259_p2 = scmp.ne.s32.totalorder %s998_s8, %s1258_s9  ;;  %p1264_p4 = scmp.lt.s32.totalorder %s1258_s9, %s1258_s9 }
  0x2f   :  { %v1420_v39 = vrot.slane %v38_v22, %v212_v27  ;;  %v1425_v43 = vrot.slane %v39_v23, %v212_v27  ;;  %v1427_v44 = vrot.slane %v40_v24, %v212_v27  ;;  %v1429_v45 = vrot.slane %v41_v25, %v212_v27 }
  0x30   :  { %1080 = vset.pattern.permute.xlu1 %v1292_v5  ;;  %63 = vperm.xlu0 %1078, %v1359_v4   ;;  %v1431_v49 = vrot.slane %v38_v22, %v276_v33  ;;  %v1433_v54 = vrot.slane %v39_v23, %v276_v33  ;;  %v1435_v55 = vrot.slane %v40_v24, %v276_v33  ;;  %p1265_p5 = por %p1264_p4, %p1263_p3 }
  0x31   :  { %135 = vperm.xlu1 %1080, %v1355_v3   ;;  %v1437_v56 = vrot.slane %v41_v25, %v276_v33  ;;  %v1439_v57 = vrot.slane %v38_v22, %v340_v41  ;;  %v1443_v61 = vrot.slane %v39_v23, %v340_v41  ;;  %v1445_v62 = vrot.slane %v40_v24, %v340_v41 }
  0x32   :  { %v1447_v63 = vrot.slane %v41_v25, %v340_v41  ;;  %p1266_p6 = pnand %p1265_p5, %p1259_p2 }
  0x34   :  { %1083 = vset.pattern.permute.xlu0 %v1290_v0 }
  0x35   :  { %1081 = vset.pattern.permute.xlu1 %v1291_v1  ;;  %107 = vperm.xlu0 %1083, %v1363_v6  }
  0x36   :  { %58 = vperm.xlu1 %1081, %v1363_v6  }
  0x39   :  { %1084 = vset.pattern.permute.xlu0 %v1292_v5 }
  0x3a   :  { %1082 = vset.pattern.permute.xlu1 %v1293_v7  ;;  %131 = vperm.xlu0 %1084, %v1351_v2  }
  0x3b   :  { %195 = vperm.xlu1 %1082, %v1351_v2  }
  0x3e   :  { %143 = vperm.xlu0 %1084, %v1359_v4  }
  0x3f   :  { %199 = vperm.xlu1 %1082, %v1355_v3  }
  0x42   :  { %1088 = vset.pattern.permute.xlu0 %v1293_v7 }
  0x43   :  { %1085 = vset.pattern.permute.xlu1 %v1290_v0  ;;  %203 = vperm.xlu0 %1088, %v1363_v6  }
  0x44   :  { %111 = vperm.xlu1 %1085, %v1359_v4  }
  0x47   :  { %1091 = vset.pattern.permute.xlu0 %v1294_v8 }
  0x48   :  { %1086 = vset.pattern.permute.xlu1 %v1292_v5  ;;  %327 = vperm.xlu0 %1091, %v1355_v3  }
  0x49   :  { %139 = vperm.xlu1 %1086, %v1363_v6  }
  0x4c   :  { %331 = vperm.xlu0 %1091, %v1363_v6  }
  0x4d   :  { %1087 = vset.pattern.permute.xlu1 %v1295_v9 }
  0x4e   :  { %259 = vperm.xlu1 %1087, %v1351_v2  }
  0x50   :  { %418 = vrot.lane.b32.xlu0 %v1351_v2, %s1296_s1 }
  0x51   :  { %1094 = vset.pattern.permute.xlu0 %v1298_v11 }
  0x52   :  { %263 = vperm.xlu1 %1087, %v1355_v3  }
  0x54   :  { %422 = vrot.lane.b32.xlu0 %v1363_v6, %s1296_s1 }
  0x56   :  { %1089 = vset.pattern.permute.xlu1 %v1293_v7 }
  0x57   :  { %207 = vperm.xlu1 %1089, %v1359_v4  }
  0x58   :  { %403 = vperm.xlu0 %1094, %v1351_v2  }
  0x5b   :  { %1090 = vset.pattern.permute.xlu1 %v1294_v8 }
  0x5c   :  { %323 = vperm.xlu1 %1090, %v1351_v2   ;;  %415 = vperm.xlu0 %1094, %v1359_v4  }
  0x60   :  { %1092 = vset.pattern.permute.xlu1 %v1295_v9  ;;  %647 = vrot.lane.b32.xlu0 %v1355_v3, %s1299_s6 }
  0x61   :  { %267 = vperm.xlu1 %1092, %v1363_v6  }
  0x64   :  { %651 = vrot.lane.b32.xlu0 %v1359_v4, %s1299_s6 }
  0x65   :  { %271 = vperm.xlu1 %1092, %v1359_v4  }
  0x69   :  { %1093 = vset.pattern.permute.xlu1 %v1294_v8 }
  0x6a   :  { %335 = vperm.xlu1 %1093, %v1359_v4  }
  0x6e   :  { %420 = vrot.lane.b32.xlu1 %v1355_v3, %s1296_s1 }
  0x6f   :  { %1095 = vset.pattern.permute.xlu1 %v1298_v11 }
  0x72   :  { %424 = vrot.lane.b32.xlu1 %v1359_v4, %s1296_s1 }
  0x76   :  { %407 = vperm.xlu1 %1095, %v1355_v3  }
  0x7a   :  { %411 = vperm.xlu1 %1095, %v1363_v6  }
  0x7e   :  { %645 = vrot.lane.b32.xlu1 %v1351_v2, %s1299_s6 }
  0x82   :  { %649 = vrot.lane.b32.xlu1 %v1363_v6, %s1299_s6 }
  0xa7   :  { %v100_v12 = vpop.permute.xlu1 %99  ;;  %v49_v14 = vpop.permute.xlu0 %48 }
  0xa8   :  { %v82_v42 = vmul.f32 %v69_v29, %v49_v14  ;;  %v83_v46 = vmul.f32 %v73_v30, %v49_v14  ;;  %v84_v47 = vmul.f32 %v77_v31, %v49_v14  ;;  %v85_v48 = vmul.f32 %v81_v32, %v49_v14 }
  0xaa   :  { %v114_v58 = vadd.f32 %v100_v12, %v82_v42  ;;  %v115_v0 = vadd.f32 %v100_v12, %v83_v46  ;;  %v116_v1 = vadd.f32 %v100_v12, %v84_v47  ;;  %v117_v5 = vadd.f32 %v100_v12, %v85_v48 }
  0xab   :  { %v104_v13 = vpop.permute.xlu1 %103  ;;  %v54_v18 = vpop.permute.xlu0 %53 }
  0xac   :  { %v86_v50 = vmul.f32 %v69_v29, %v54_v18  ;;  %v87_v51 = vmul.f32 %v73_v30, %v54_v18  ;;  %v88_v52 = vmul.f32 %v77_v31, %v54_v18  ;;  %v89_v53 = vmul.f32 %v81_v32, %v54_v18 }
  0xae   :  { %v118_v8 = vadd.f32 %v104_v13, %v86_v50  ;;  %v119_v9 = vadd.f32 %v104_v13, %v87_v51  ;;  %v120_v11 = vadd.f32 %v104_v13, %v88_v52  ;;  %v121_v14 = vadd.f32 %v104_v13, %v89_v53 }
  0xaf   :  { %v64_v21 = vpop.permute.xlu0 %63 }
  0xb0   :  { %v1397_v16 = vpop.permute.xlu1 %135  ;;  %v94_v18 = vmul.f32 %v69_v29, %v64_v21  ;;  %v1451_v20 = vmul.f32 %v73_v30, %v64_v21  ;;  %v1453_v22 = vmul.f32 %v77_v31, %v64_v21  ;;  %v1456_v24 = vmul.f32 %v81_v32, %v64_v21 }
  0xb1   :  { %v166_v7 = vmul.f32 %v1410_v34, %v1397_v16  ;;  %v167_v27 = vmul.f32 %v1412_v35, %v1397_v16  ;;  %v168_v13 = vmul.f32 %v1416_v37, %v1397_v16  ;;  %v169_v33 = vmul.f32 %v1418_v38, %v1397_v16 }
  0xb3   :  { %v182_v41 = vadd.f32 %v166_v7, %v118_v8  ;;  %v185_v15 = vadd.f32 %v169_v33, %v121_v14 }
  0xb4   :  { %v1414_v36 = vpop.permute.xlu0 %107 }
  0xb5   :  { %v1402_v19 = vpop.permute.xlu1 %58 }
  0xb6   :  { %v90_v21 = vmul.f32 %v69_v29, %v1402_v19  ;;  %v91_v47 = vmul.f32 %v73_v30, %v1402_v19  ;;  %v92_v48 = vmul.f32 %v77_v31, %v1402_v19  ;;  %v93_v50 = vmul.f32 %v81_v32, %v1402_v19 }
  0xb7   :  { %v183_v30 = vadd.f32 %v167_v27, %v119_v9  ;;  %v184_v31 = vadd.f32 %v168_v13, %v120_v11 }
  0xb8   :  { %v124_v9 = vadd.f32 %v1414_v36, %v92_v48  ;;  %v125_v11 = vadd.f32 %v1414_v36, %v93_v50 }
  0xb9   :  { %v132_v59 = vpop.permute.xlu0 %131 }
  0xba   :  { %v1407_v28 = vpop.permute.xlu1 %195  ;;  %v162_v23 = vmul.f32 %v1410_v34, %v132_v59  ;;  %v163_v25 = vmul.f32 %v1412_v35, %v132_v59  ;;  %v164_v12 = vmul.f32 %v1416_v37, %v132_v59  ;;  %v165_v26 = vmul.f32 %v1418_v38, %v132_v59 }
  0xbb   :  { %v226_v52 = vmul.f32 %v1420_v39, %v1407_v28  ;;  %v227_v53 = vmul.f32 %v1425_v43, %v1407_v28  ;;  %v228_v16 = vmul.f32 %v1427_v44, %v1407_v28  ;;  %v229_v29 = vmul.f32 %v1429_v45, %v1407_v28 }
  0xbc   :  { %v178_v51 = vadd.f32 %v162_v23, %v114_v58  ;;  %v179_v59 = vadd.f32 %v163_v25, %v115_v0  ;;  %v180_v7 = vadd.f32 %v164_v12, %v116_v1  ;;  %v181_v8 = vadd.f32 %v165_v26, %v117_v5 }
  0xbd   :  { %v144_v42 = vpop.permute.xlu0 %143  ;;  %v122_v58 = vadd.f32 %v1414_v36, %v90_v21  ;;  %v123_v28 = vadd.f32 %v1414_v36, %v91_v47 }
  0xbe   :  { %v1422_v40 = vpop.permute.xlu1 %199  ;;  %v242_v14 = vadd.f32 %v226_v52, %v178_v51  ;;  %v243_v25 = vadd.f32 %v227_v53, %v179_v59  ;;  %v244_v12 = vadd.f32 %v228_v16, %v180_v7  ;;  %v245_v26 = vadd.f32 %v229_v29, %v181_v8 }
  0xbf   :  { %v230_v19 = vmul.f32 %v1420_v39, %v1422_v40  ;;  %v231_v23 = vmul.f32 %v1425_v43, %v1422_v40  ;;  %v232_v0 = vmul.f32 %v1427_v44, %v1422_v40  ;;  %v233_v1 = vmul.f32 %v1429_v45, %v1422_v40 }
  0xc0   :  { %v174_v27 = vmul.f32 %v1410_v34, %v144_v42  ;;  %v1493_v33 = vmul.f32 %v1412_v35, %v144_v42  ;;  %v1496_v21 = vmul.f32 %v1416_v37, %v144_v42  ;;  %v1499_v40 = vmul.f32 %v1418_v38, %v144_v42 }
  0xc1   :  { %v246_v13 = vadd.f32 %v230_v19, %v182_v41  ;;  %v247_v48 = vadd.f32 %v231_v23, %v183_v30  ;;  %v248_v10 = vadd.f32 %v232_v0, %v184_v31  ;;  %v249_v36 = vadd.f32 %v233_v1, %v185_v15 }
  0xc2   :  { %v204_v32 = vpop.permute.xlu0 %203  ;;  %1630 = vst [vmem:[#allocation16_spill] sm:$0xff] %v1499_v40 }
  0xc3   :  { %v1441_v60 = vpop.permute.xlu1 %111  ;;  %v234_v50 = vmul.f32 %v1420_v39, %v204_v32  ;;  %v235_v52 = vmul.f32 %v1425_v43, %v204_v32  ;;  %v236_v59 = vmul.f32 %v1427_v44, %v204_v32  ;;  %v237_v42 = vmul.f32 %v1429_v45, %v204_v32 }
  0xc4   :  { %v126_v15 = vadd.f32 %v1441_v60, %v94_v18 }
  0xc7   :  { %v328_v47 = vpop.permute.xlu0 %327 }
  0xc8   :  { %v140_v46 = vpop.permute.xlu1 %139  ;;  %v358_v8 = vmul.f32 %v1439_v57, %v328_v47  ;;  %v359_v30 = vmul.f32 %v1443_v61, %v328_v47  ;;  %v360_v31 = vmul.f32 %v1445_v62, %v328_v47  ;;  %v361_v1 = vmul.f32 %v1447_v63, %v328_v47 }
  0xc9   :  { %v170_v19 = vmul.f32 %v1410_v34, %v140_v46  ;;  %v171_v23 = vmul.f32 %v1412_v35, %v140_v46  ;;  %v172_v32 = vmul.f32 %v1416_v37, %v140_v46  ;;  %v127_v34 = vadd.f32 %v1441_v60, %v1451_v20 }
  0xca   :  { %v128_v35 = vadd.f32 %v1441_v60, %v1453_v22  ;;  %v129_v37 = vadd.f32 %v1441_v60, %v1456_v24 }
  0xcd   :  { %v260_v5 = vpop.permute.xlu1 %259 }
  0xce   :  { %v290_v17 = vmul.f32 %v1431_v49, %v260_v5  ;;  %v293_v47 = vmul.f32 %v1437_v56, %v260_v5 }
  0xd1   :  { %v264_v51 = vpop.permute.xlu1 %263 }
  0xd2   :  { %v294_v41 = vmul.f32 %v1431_v49, %v264_v51  ;;  %v295_v53 = vmul.f32 %v1433_v54, %v264_v51  ;;  %v296_v16 = vmul.f32 %v1435_v55, %v264_v51  ;;  %v297_v7 = vmul.f32 %v1437_v56, %v264_v51 }
  0xd3   :  { %v173_v51 = vmul.f32 %v1418_v38, %v140_v46  ;;  %v1527_v38 = vadd.f32 %v174_v27, %v126_v15  ;;  %v186_v46 = vadd.f32 %v170_v19, %v122_v58  ;;  %v191_v19 = vadd.f32 %v1493_v33, %v127_v34 }
  0xd4   :  { %v310_v29 = vadd.f32 %v294_v41, %v246_v13  ;;  %v311_v0 = vadd.f32 %v295_v53, %v247_v48  ;;  %v312_v4 = vadd.f32 %v296_v16, %v248_v10  ;;  %v291_v13 = vmul.f32 %v1433_v54, %v260_v5 }
  0xd5   :  { %v292_v41 = vmul.f32 %v1435_v55, %v260_v5  ;;  %v313_v6 = vadd.f32 %v297_v7, %v249_v36  ;;  %v187_v10 = vadd.f32 %v171_v23, %v123_v28  ;;  %v188_v53 = vadd.f32 %v172_v32, %v124_v9 }
  0xd6   :  { %v208_v18 = vpop.permute.xlu1 %207  ;;  %v374_v3 = vadd.f32 %v358_v8, %v310_v29  ;;  %v375_v48 = vadd.f32 %v359_v30, %v311_v0  ;;  %v189_v16 = vadd.f32 %v173_v51, %v125_v11  ;;  %v306_v36 = vadd.f32 %v290_v17, %v242_v14  ;;  %v332_v8 = vpop.permute.xlu0 %331 }
  0xd7   :  { %v376_v7 = vadd.f32 %v360_v31, %v312_v4  ;;  %v307_v29 = vadd.f32 %v291_v13, %v243_v25  ;;  %v308_v20 = vadd.f32 %v292_v41, %v244_v12  ;;  %v377_v2 = vadd.f32 %v361_v1, %v313_v6 }
  0xd8   :  { %1102 = vtanh.f32 %v374_v3  ;;  %v309_v5 = vadd.f32 %v293_v47, %v245_v26  ;;  %v362_v28 = vmul.f32 %v1439_v57, %v332_v8  ;;  %v363_v4 = vmul.f32 %v1443_v61, %v332_v8 }
  0xd9   :  { %1104 = vtanh.f32 %v375_v48  ;;  %v250_v3 = vadd.f32 %v234_v50, %v186_v46  ;;  %v364_v14 = vmul.f32 %v1445_v62, %v332_v8  ;;  %v251_v25 = vadd.f32 %v235_v52, %v187_v10  ;;  %v1631_v10 = vld [vmem:[#allocation16_spill] sm:$0xff] }
  0xda   :  { %1106 = vtanh.f32 %v376_v7  ;;  %v252_v12 = vadd.f32 %v236_v59, %v188_v53  ;;  %v253_v27 = vadd.f32 %v237_v42, %v189_v16  ;;  %v239_v50 = vmul.f32 %v1425_v43, %v208_v18 }
  0xdb   :  { %v324_v22 = vpop.permute.xlu1 %323  ;;  %1108 = vtanh.f32 %v377_v2  ;;  %v240_v23 = vmul.f32 %v1427_v44, %v208_v18  ;;  %v241_v0 = vmul.f32 %v1429_v45, %v208_v18  ;;  %v365_v1 = vmul.f32 %v1447_v63, %v332_v8 }
  0xdc   :  { %v354_v40 = vmul.f32 %v1439_v57, %v324_v22  ;;  %v355_v60 = vmul.f32 %v1443_v61, %v324_v22  ;;  %v356_v24 = vmul.f32 %v1445_v62, %v324_v22  ;;  %v357_v58 = vmul.f32 %v1447_v63, %v324_v22 }
  0xdd   :  { %v192_v46 = vadd.f32 %v1496_v21, %v128_v35  ;;  %v193_v47 = vadd.f32 %v1631_v10, %v129_v37 }
  0xde   :  { %v370_v17 = vadd.f32 %v354_v40, %v306_v36  ;;  %v371_v9 = vadd.f32 %v355_v60, %v307_v29  ;;  %v372_v6 = vadd.f32 %v356_v24, %v308_v20  ;;  %v373_v11 = vadd.f32 %v357_v58, %v309_v5 }
  0xdf   :  { %v238_v40 = vmul.f32 %v1420_v39, %v208_v18  ;;  %v255_v18 = vadd.f32 %v239_v50, %v191_v19  ;;  %v256_v36 = vadd.f32 %v240_v23, %v192_v46  ;;  %v257_v7 = vadd.f32 %v241_v0, %v193_v47  ;;  %v1633_v19 = vld [vmem:[#allocation11_spill] sm:$0xff]  ;;  %v1634_v23 = vld [vmem:[#allocation12_spill] sm:$0xff]  ;;  %v1635_v0 = vld [vmem:[#allocation14_spill] sm:$0xff] }
  0xe0   :  { %1110 = vtanh.f32 %v370_v17  ;;  %v268_v15 = vpop.permute.xlu1 %267 }
  0xe1   :  { %1112 = vtanh.f32 %v371_v9  ;;  %v298_v26 = vmul.f32 %v1431_v49, %v268_v15  ;;  %v299_v30 = vmul.f32 %v1433_v54, %v268_v15  ;;  %v300_v31 = vmul.f32 %v1435_v55, %v268_v15 }
  0xe2   :  { %1114 = vtanh.f32 %v372_v6  ;;  %v301_v2 = vmul.f32 %v1437_v56, %v268_v15  ;;  %v1103_v51 = vpop.eup %1102  ;;  %v254_v45 = vadd.f32 %v238_v40, %v1527_v38  ;;  %v419_v40 = vpop.permute.xlu0 %418 }
  0xe3   :  { %1116 = vtanh.f32 %v373_v11  ;;  %v314_v52 = vadd.f32 %v298_v26, %v250_v3  ;;  %v315_v59 = vadd.f32 %v299_v30, %v251_v25  ;;  %v316_v42 = vadd.f32 %v300_v31, %v252_v12  ;;  %v1105_v44 = vpop.eup %1104 }
  0xe4   :  { %v272_v32 = vpop.permute.xlu1 %271  ;;  %v317_v39 = vadd.f32 %v301_v2, %v253_v27  ;;  %v1107_v16 = vpop.eup %1106  ;;  %v1632_v2 = vmov 0.0  }
  0xe5   :  { %v378_v13 = vadd.f32 %v362_v28, %v314_v52  ;;  %v379_v43 = vadd.f32 %v363_v4, %v315_v59  ;;  %v302_v41 = vmul.f32 %v1431_v49, %v272_v32  ;;  %v303_v48 = vmul.f32 %v1433_v54, %v272_v32  ;;  %v1109_v49 = vpop.eup %1108 }
  0xe6   :  { %v304_v33 = vmul.f32 %v1435_v55, %v272_v32  ;;  %v380_v34 = vadd.f32 %v364_v14, %v316_v42  ;;  %v305_v53 = vmul.f32 %v1437_v56, %v272_v32  ;;  %v381_v8 = vadd.f32 %v365_v1, %v317_v39  ;;  %v423_v52 = vpop.permute.xlu0 %422  ;;  %v1636_v32 = vld [vmem:[#allocation13_spill] sm:$0xff]  ;;  %v923_v39 = vld [vmem:[#allocation5] sm:$0x1] }
  0xe7   :  { %1118 = vtanh.f32 %v378_v13  ;;  %v318_v21 = vadd.f32 %v302_v41, %v254_v45  ;;  %v319_v35 = vadd.f32 %v303_v48, %v255_v18  ;;  %v1300_v42 = vmov 72  }
  0xe8   :  { %1120 = vtanh.f32 %v379_v43  ;;  %v320_v29 = vadd.f32 %v304_v33, %v256_v36  ;;  %v321_v56 = vadd.f32 %v305_v53, %v257_v7  ;;  %1096 = vset.pattern.permute.xlu1 %v1300_v42  ;;  %1097 = vset.pattern.permute.xlu0 %v1300_v42  ;;  %v1301_v1 = vmov 69  }
  0xe9   :  { %v336_v37 = vpop.permute.xlu1 %335  ;;  %1122 = vtanh.f32 %v380_v34  ;;  %630 = vperm.xlu1 %1096, %v1633_v19   ;;  %634 = vperm.xlu0 %1097, %v1634_v23  }
  0xea   :  { %v1111_v54 = vpop.eup %1110  ;;  %v366_v55 = vmul.f32 %v1439_v57, %v336_v37  ;;  %v367_v38 = vmul.f32 %v1443_v61, %v336_v37  ;;  %v368_v20 = vmul.f32 %v1445_v62, %v336_v37  ;;  %v369_v60 = vmul.f32 %v1447_v63, %v336_v37  ;;  %v404_v13 = vpop.permute.xlu0 %403 }
  0xeb   :  { %v1113_v22 = vpop.eup %1112  ;;  %v1029_v24 = vpack.c.bf16 %v1103_v51, %v1111_v54  ;;  %1124 = vtanh.f32 %v381_v8  ;;  %v1302_v51 = vmov 73  }
  0xec   :  { %v1115_v58 = vpop.eup %1114  ;;  %v382_v5 = vadd.f32 %v366_v55, %v318_v21  ;;  %v383_v28 = vadd.f32 %v367_v38, %v319_v35  ;;  %v384_v4 = vadd.f32 %v368_v20, %v320_v29  ;;  %v1027_v17 = vpack.c.bf16 %v1105_v44, %v1113_v22 }
  0xed   :  { %v1117_v9 = vpop.eup %1116  ;;  %v385_v6 = vadd.f32 %v369_v60, %v321_v56  ;;  %v1037_v3 = vpack.c.bf16 %v1107_v16, %v1115_v58  ;;  %v421_v50 = vpop.permute.xlu1 %420  ;;  %638 = vperm.xlu1 %1096, %v1635_v0   ;;  %1098 = vset.pattern.permute.xlu0 %v1301_v1 }
  0xee   :  { %1126 = vtanh.f32 %v382_v5  ;;  %1028 = vmatprep.subr.bf16.mxu0 %v1027_v17  ;;  %v1035_v57 = vpack.c.bf16 %v1109_v49, %v1117_v9  ;;  %856 = vperm.xlu0 %1098, %v1633_v19   ;;  %v416_v22 = vpop.permute.xlu0 %415 }
  0xef   :  { %1128 = vtanh.f32 %v383_v28  ;;  %1030 = vmatpush1.bf16.msra.mxu0 %v1029_v24 }
  0xf0   :  { %1130 = vtanh.f32 %v384_v4  ;;  %1036 = vmatprep.subr.bf16.mxu1 %v1035_v57 }
  0xf1   :  { %1132 = vtanh.f32 %v385_v6  ;;  %1038 = vmatpush1.bf16.msra.mxu1 %v1037_v3  ;;  %v1119_v61 = vpop.eup %1118  ;;  %v425_v59 = vpop.permute.xlu1 %424  ;;  %642 = vperm.xlu1 %1096, %v1636_v32  }
  0xf2   :  { %v1121_v62 = vpop.eup %1120  ;;  %868 = vperm.xlu0 %1098, %v1636_v32  }
  0xf3   :  { %v1123_v63 = vpop.eup %1122 }
  0xf5   :  { %v1125_v11 = vpop.eup %1124  ;;  %1099 = vset.pattern.permute.xlu1 %v1301_v1  ;;  %v408_v41 = vpop.permute.xlu1 %407 }
  0xf6   :  { %860 = vperm.xlu1 %1099, %v1634_v23   ;;  %1101 = vset.pattern.permute.xlu0 %v1302_v51 }
  0xf8   :  { %v1127_v14 = vpop.eup %1126 }
  0xf9   :  { %v1129_v25 = vpop.eup %1128  ;;  %v1033_v12 = vpack.c.bf16 %v1127_v14, %v1119_v61  ;;  %v412_v36 = vpop.permute.xlu1 %411 }
  0xfa   :  { %v1131_v27 = vpop.eup %1130  ;;  %v1031_v15 = vpack.c.bf16 %v1129_v25, %v1121_v62  ;;  %864 = vperm.xlu1 %1099, %v1635_v0  }
  0xfb   :  { %v1133_v26 = vpop.eup %1132  ;;  %v1041_v30 = vpack.c.bf16 %v1131_v27, %v1123_v63 }
  0xfc   :  { %1032 = vmatprep.subr.bf16.mxu0 %v1031_v15  ;;  %v1039_v31 = vpack.c.bf16 %v1133_v26, %v1125_v11 }
  0xfd   :  { %1034 = vmatpush1.bf16.msra.mxu0 %v1033_v12  ;;  %v646_v32 = vpop.permute.xlu1 %645 }
  0xfe   :  { %1040 = vmatprep.subr.bf16.mxu1 %v1039_v31  ;;  %1100 = vset.pattern.permute.xlu1 %v1302_v51  ;;  %v648_v51 = vpop.permute.xlu0 %647 }
  0xff   :  { %1042 = vmatpush1.bf16.msra.mxu1 %v1041_v30  ;;  %926 = vperm.xlu1 %1100, %v923_v39  }
 0x100   :  { %1007 = vmatmul.mubr.msk.f32.vlgmr.msra.gmra.mrb[0].mxu0 %vm426_vm0, %v419_v40 }
 0x101   :  { %505 = vmatprep.mubr.f32.mxu0 %v1632_v2  ;;  %v650_v39 = vpop.permute.xlu1 %649 }
 0x102   :  { %1011 = vmatmul.mubr.msk.f32.vlgmr.msra.gmra.mrb[0].mxu1 %vm426_vm0, %v419_v40 }
 0x103   :  { %594 = vmatprep.mubr.f32.mxu1 %v1632_v2 }
 0x104   :  { %1008 = vmatmul.mubr.msk.f32.gmra.mrb[2].mxu0 %vm426_vm0, %v421_v50 }
 0x105   :  { %511 = vmatprep.mubr.f32.mxu0 %v1632_v2 }
 0x106   :  { %1012 = vmatmul.mubr.msk.f32.gmra.mrb[2].mxu1 %vm426_vm0, %v421_v50 }
 0x107   :  { %600 = vmatprep.mubr.f32.mxu1 %v1632_v2 }
 0x108   :  { %1009 = vmatmul.mubr.msk.f32.gmra.mrb[4].mxu0 %vm426_vm0, %v423_v52 }
 0x109   :  { %517 = vmatprep.mubr.f32.mxu0 %v1632_v2 }
 0x10a   :  { %1013 = vmatmul.mubr.msk.f32.gmra.mrb[4].mxu1 %vm426_vm0, %v423_v52 }
 0x10b   :  { %606 = vmatprep.mubr.f32.mxu1 %v1632_v2 }
 0x10c   :  { %1010 = vmatmul.mubr.msk.f32.gmra.mrb[6].mxu0 %vm426_vm0, %v425_v59 }
 0x10d   :  { %725 = vmatprep.mubr.f32.mxu0 %v1632_v2 }
 0x10e   :  { %1014 = vmatmul.mubr.msk.f32.gmra.mrb[6].mxu1 %vm426_vm0, %v425_v59 }
 0x10f   :  { %814 = vmatprep.mubr.f32.mxu1 %v1632_v2 }
 0x1d3   :  { %v501_v43 = vpop.f32.mrb[0].mxu0 }
 0x1d4   :  { %v502_v46 = vadd.f32 %v501_v43, %v404_v13  ;;  %v503_v10 = vpop.f32.mrb[1].mxu0  ;;  %v631_v43 = vpop.permute.xlu1 %630 }
 0x1d5   :  { %v590_v47 = vpop.f32.mrb[0].mxu1  ;;  %v504_v48 = vadd.f32 %v503_v10, %v404_v13 }
 0x1d6   :  { %1134 = vtanh.f32 %v502_v46  ;;  %v591_v33 = vadd.f32 %v590_v47, %v404_v13  ;;  %v592_v44 = vpop.f32.mrb[1].mxu1 }
 0x1d7   :  { %1136 = vtanh.f32 %v504_v48  ;;  %v593_v45 = vadd.f32 %v592_v44, %v404_v13  ;;  %v507_v18 = vpop.f32.mrb[2].mxu0  ;;  %v652_v13 = vpop.permute.xlu0 %651 }
 0x1d8   :  { %1138 = vtanh.f32 %v591_v33  ;;  %v508_v34 = vadd.f32 %v507_v18, %v408_v41  ;;  %v509_v53 = vpop.f32.mrb[3].mxu0  ;;  %v639_v18 = vpop.permute.xlu1 %638 }
 0x1d9   :  { %1140 = vtanh.f32 %v593_v45  ;;  %v596_v16 = vpop.f32.mrb[2].mxu1  ;;  %v510_v7 = vadd.f32 %v509_v53, %v408_v41 }
 0x1da   :  { %1142 = vtanh.f32 %v508_v34  ;;  %v597_v49 = vadd.f32 %v596_v16, %v408_v41  ;;  %v598_v8 = vpop.f32.mrb[3].mxu1 }
 0x1db   :  { %1144 = vtanh.f32 %v510_v7  ;;  %v599_v21 = vadd.f32 %v598_v8, %v408_v41  ;;  %v513_v35 = vpop.f32.mrb[4].mxu0  ;;  %v635_v33 = vpop.permute.xlu0 %634 }
 0x1dc   :  { %1146 = vtanh.f32 %v597_v49  ;;  %v514_v37 = vadd.f32 %v513_v35, %v412_v36  ;;  %v515_v54 = vpop.f32.mrb[5].mxu0 }
 0x1dd   :  { %1148 = vtanh.f32 %v599_v21  ;;  %v602_v29 = vpop.f32.mrb[4].mxu1  ;;  %v516_v55 = vadd.f32 %v515_v54, %v412_v36 }
 0x1de   :  { %1150 = vtanh.f32 %v514_v37  ;;  %v603_v38 = vadd.f32 %v602_v29, %v412_v36  ;;  %v604_v20 = vpop.f32.mrb[5].mxu1  ;;  %v643_v29 = vpop.permute.xlu1 %642 }
 0x1df   :  { %1152 = vtanh.f32 %v516_v55  ;;  %v605_v56 = vadd.f32 %v604_v20, %v412_v36  ;;  %v519_v60 = vpop.f32.mrb[6].mxu0 }
 0x1e0   :  { %v1135_v24 = vpop.eup %1134  ;;  %1154 = vtanh.f32 %v603_v38  ;;  %v520_v58 = vadd.f32 %v519_v60, %v416_v22  ;;  %v521_v5 = vpop.f32.mrb[7].mxu0 }
 0x1e1   :  { %v1137_v28 = vpop.eup %1136  ;;  %1156 = vtanh.f32 %v605_v56  ;;  %v608_v4 = vpop.f32.mrb[6].mxu1  ;;  %v522_v17 = vadd.f32 %v521_v5, %v416_v22 }
 0x1e2   :  { %v1139_v9 = vpop.eup %1138  ;;  %1158 = vtanh.f32 %v520_v58  ;;  %v609_v6 = vadd.f32 %v608_v4, %v416_v22  ;;  %v610_v3 = vpop.f32.mrb[7].mxu1 }
 0x1e3   :  { %v1141_v57 = vpop.eup %1140  ;;  %1160 = vtanh.f32 %v522_v17  ;;  %v611_v61 = vadd.f32 %v610_v3, %v416_v22 }
 0x1e4   :  { %v1143_v62 = vpop.eup %1142  ;;  %1162 = vtanh.f32 %v609_v6 }
 0x1e5   :  { %v1145_v63 = vpop.eup %1144  ;;  %1164 = vtanh.f32 %v611_v61  ;;  %v1045_v11 = vpack.c.bf16 %v1143_v62, %v1135_v24  ;;  %v857_v61 = vpop.permute.xlu0 %856 }
 0x1e6   :  { %v1147_v14 = vpop.eup %1146  ;;  %v1043_v25 = vpack.c.bf16 %v1145_v63, %v1137_v28  ;;  %v861_v28 = vpop.permute.xlu1 %860 }
 0x1e7   :  { %v1149_v12 = vpop.eup %1148  ;;  %v1053_v27 = vpack.c.bf16 %v1147_v14, %v1139_v9 }
 0x1e8   :  { %v1151_v15 = vpop.eup %1150  ;;  %1044 = vmatprep.subr.bf16.mxu0 %v1043_v25  ;;  %v1051_v26 = vpack.c.bf16 %v1149_v12, %v1141_v57 }
 0x1e9   :  { %v1153_v30 = vpop.eup %1152  ;;  %1046 = vmatpush1.bf16.msra.mxu0 %v1045_v11 }
 0x1ea   :  { %v1155_v31 = vpop.eup %1154  ;;  %1052 = vmatprep.subr.bf16.mxu1 %v1051_v26 }
 0x1eb   :  { %v1157_v40 = vpop.eup %1156  ;;  %1054 = vmatpush1.bf16.msra.mxu1 %v1053_v27 }
 0x1ec   :  { %v1159_v50 = vpop.eup %1158 }
 0x1ed   :  { %v1161_v52 = vpop.eup %1160  ;;  %v1049_v59 = vpack.c.bf16 %v1159_v50, %v1151_v15 }
 0x1ee   :  { %v1163_v42 = vpop.eup %1162  ;;  %v1047_v19 = vpack.c.bf16 %v1161_v52, %v1153_v30  ;;  %v865_v30 = vpop.permute.xlu1 %864 }
 0x1ef   :  { %v1165_v23 = vpop.eup %1164  ;;  %v1057_v0 = vpack.c.bf16 %v1163_v42, %v1155_v31 }
 0x1f0   :  { %1048 = vmatprep.subr.bf16.mxu0 %v1047_v19  ;;  %v1055_v1 = vpack.c.bf16 %v1165_v23, %v1157_v40 }
 0x1f1   :  { %1050 = vmatpush1.bf16.msra.mxu0 %v1049_v59 }
 0x1f2   :  { %1056 = vmatprep.subr.bf16.mxu1 %v1055_v1 }
 0x1f3   :  { %1058 = vmatpush1.bf16.msra.mxu1 %v1057_v0 }
 0x1f4   :  { %1015 = vmatmul.mubr.msk.f32.vlgmr.msra.gmra.mrb[8].mxu0 %vm426_vm0, %v646_v32 }
 0x1f5   :  { %731 = vmatprep.mubr.f32.mxu0 %v1632_v2 }
 0x1f6   :  { %1019 = vmatmul.mubr.msk.f32.vlgmr.msra.gmra.mrb[8].mxu1 %vm426_vm0, %v646_v32 }
 0x1f7   :  { %820 = vmatprep.mubr.f32.mxu1 %v1632_v2 }
 0x1f8   :  { %1016 = vmatmul.mubr.msk.f32.gmra.mrb[10].mxu0 %vm426_vm0, %v648_v51 }
 0x1f9   :  { %737 = vmatprep.mubr.f32.mxu0 %v1632_v2 }
 0x1fa   :  { %1020 = vmatmul.mubr.msk.f32.gmra.mrb[10].mxu1 %vm426_vm0, %v648_v51 }
 0x1fb   :  { %826 = vmatprep.mubr.f32.mxu1 %v1632_v2 }
 0x1fc   :  { %1017 = vmatmul.mubr.msk.f32.gmra.mrb[12].mxu0 %vm426_vm0, %v650_v39 }
 0x1fd   :  { %743 = vmatprep.mubr.f32.mxu0 %v1632_v2 }
 0x1fe   :  { %1021 = vmatmul.mubr.msk.f32.gmra.mrb[12].mxu1 %vm426_vm0, %v650_v39 }
 0x1ff   :  { %832 = vmatprep.mubr.f32.mxu1 %v1632_v2 }
 0x200   :  { %1018 = vmatmul.mubr.msk.f32.gmra.mrb[14].mxu0 %vm426_vm0, %v652_v13 }
 0x202   :  { %1022 = vmatmul.mubr.msk.f32.gmra.mrb[14].mxu1 %vm426_vm0, %v652_v13 }
 0x2c7   :  { %v727_v41 = vpop.f32.mrb[8].mxu0 }
 0x2c8   :  { %v728_v46 = vadd.f32 %v727_v41, %v631_v43  ;;  %v729_v10 = vpop.f32.mrb[9].mxu0 }
 0x2c9   :  { %v816_v47 = vpop.f32.mrb[8].mxu1  ;;  %v730_v48 = vadd.f32 %v729_v10, %v631_v43 }
 0x2ca   :  { %1166 = vtanh.f32 %v728_v46  ;;  %v817_v44 = vadd.f32 %v816_v47, %v631_v43  ;;  %v818_v45 = vpop.f32.mrb[9].mxu1 }
 0x2cb   :  { %1168 = vtanh.f32 %v730_v48  ;;  %v819_v34 = vadd.f32 %v818_v45, %v631_v43  ;;  %v733_v53 = vpop.f32.mrb[10].mxu0  ;;  %v869_v48 = vpop.permute.xlu0 %868 }
 0x2cc   :  { %1170 = vtanh.f32 %v817_v44  ;;  %v734_v2 = vadd.f32 %v733_v53, %v635_v33  ;;  %v735_v16 = vpop.f32.mrb[11].mxu0 }
 0x2cd   :  { %1172 = vtanh.f32 %v819_v34  ;;  %v822_v36 = vpop.f32.mrb[10].mxu1  ;;  %v736_v7 = vadd.f32 %v735_v16, %v635_v33 }
 0x2ce   :  { %v823_v49 = vadd.f32 %v822_v36, %v635_v33  ;;  %1174 = vtanh.f32 %v734_v2  ;;  %v824_v8 = vpop.f32.mrb[11].mxu1 }
 0x2cf   :  { %1176 = vtanh.f32 %v736_v7  ;;  %v825_v21 = vadd.f32 %v824_v8, %v635_v33  ;;  %v739_v35 = vpop.f32.mrb[12].mxu0 }
 0x2d0   :  { %1178 = vtanh.f32 %v823_v49  ;;  %v740_v37 = vadd.f32 %v739_v35, %v639_v18  ;;  %v741_v54 = vpop.f32.mrb[13].mxu0 }
 0x2d1   :  { %1180 = vtanh.f32 %v825_v21  ;;  %v828_v55 = vpop.f32.mrb[12].mxu1  ;;  %v742_v38 = vadd.f32 %v741_v54, %v639_v18 }
 0x2d2   :  { %1182 = vtanh.f32 %v740_v37  ;;  %v829_v20 = vadd.f32 %v828_v55, %v639_v18  ;;  %v830_v22 = vpop.f32.mrb[13].mxu1 }
 0x2d3   :  { %1184 = vtanh.f32 %v742_v38  ;;  %v831_v56 = vadd.f32 %v830_v22, %v639_v18  ;;  %v745_v60 = vpop.f32.mrb[14].mxu0 }
 0x2d4   :  { %v1167_v24 = vpop.eup %1166  ;;  %1186 = vtanh.f32 %v829_v20  ;;  %v746_v58 = vadd.f32 %v745_v60, %v643_v29  ;;  %v747_v5 = vpop.f32.mrb[15].mxu0 }
 0x2d5   :  { %v1169_v4 = vpop.eup %1168  ;;  %1188 = vtanh.f32 %v831_v56  ;;  %v834_v17 = vpop.f32.mrb[14].mxu1  ;;  %v748_v9 = vadd.f32 %v747_v5, %v643_v29  ;;  %v871_v12 = vmul.f32 %v1167_v24, %v857_v61 }
 0x2d6   :  { %v1171_v6 = vpop.eup %1170  ;;  %1190 = vtanh.f32 %v746_v58  ;;  %v835_v3 = vadd.f32 %v834_v17, %v643_v29  ;;  %v836_v57 = vpop.f32.mrb[15].mxu1  ;;  %v872_v26 = vmul.f32 %v1169_v4, %v857_v61 }
 0x2d7   :  { %v1173_v62 = vpop.eup %1172  ;;  %1192 = vtanh.f32 %v748_v9  ;;  %v837_v63 = vadd.f32 %v836_v57, %v643_v29  ;;  %v873_v50 = vmul.f32 %v1171_v6, %v857_v61  ;;  %v927_v6 = vpop.permute.xlu1 %926 }
 0x2d8   :  { %v1175_v11 = vpop.eup %1174  ;;  %1194 = vtanh.f32 %v835_v3  ;;  %v874_v19 = vmul.f32 %v1173_v62, %v857_v61 }
 0x2d9   :  { %v1177_v14 = vpop.eup %1176  ;;  %1196 = vtanh.f32 %v837_v63  ;;  %v875_v25 = vmul.f32 %v1175_v11, %v861_v28 }
 0x2da   :  { %v1179_v27 = vpop.eup %1178  ;;  %v876_v15 = vmul.f32 %v1177_v14, %v861_v28 }
 0x2db   :  { %v1181_v31 = vpop.eup %1180  ;;  %v877_v40 = vmul.f32 %v1179_v27, %v861_v28  ;;  %v887_v52 = vadd.f32 %v875_v25, %v871_v12 }
 0x2dc   :  { %v1183_v59 = vpop.eup %1182  ;;  %v878_v42 = vmul.f32 %v1181_v31, %v861_v28  ;;  %v896_v23 = vadd.f32 %v876_v15, %v872_v26 }
 0x2dd   :  { %v1185_v0 = vpop.eup %1184  ;;  %v905_v1 = vadd.f32 %v877_v40, %v873_v50  ;;  %v879_v32 = vmul.f32 %v1183_v59, %v865_v30 }
 0x2de   :  { %v1187_v51 = vpop.eup %1186  ;;  %v914_v39 = vadd.f32 %v878_v42, %v874_v19  ;;  %v880_v13 = vmul.f32 %v1185_v0, %v865_v30 }
 0x2df   :  { %v1189_v43 = vpop.eup %1188  ;;  %v881_v41 = vmul.f32 %v1187_v51, %v865_v30  ;;  %v888_v46 = vadd.f32 %v887_v52, %v879_v32  ;;  %v1303_v51 = vmov 1966171168  }
 0x2e0   :  { %v1191_v10 = vpop.eup %1190  ;;  %v882_v47 = vmul.f32 %v1189_v43, %v865_v30  ;;  %v897_v33 = vadd.f32 %v896_v23, %v880_v13 }
 0x2e1   :  { %v1193_v44 = vpop.eup %1192  ;;  %v883_v45 = vmul.f32 %v1191_v10, %v869_v48  ;;  %v906_v18 = vadd.f32 %v905_v1, %v881_v41  ;;  %v1637_v41 = vld [vmem:[#allocation15_spill] sm:$0xff] }
 0x2e2   :  { %v1195_v34 = vpop.eup %1194  ;;  %v884_v53 = vmul.f32 %v1193_v44, %v869_v48  ;;  %v915_v2 = vadd.f32 %v914_v39, %v882_v47  ;;  %v964_v39 = vunpack.c.l.s4 %v1303_v51 }
 0x2e3   :  { %v1197_v16 = vpop.eup %1196  ;;  %v885_v36 = vmul.f32 %v1195_v34, %v869_v48  ;;  %v889_v7 = vadd.f32 %v888_v46, %v883_v45 }
 0x2e4   :  { %v886_v49 = vmul.f32 %v1197_v16, %v869_v48  ;;  %v898_v8 = vadd.f32 %v897_v33, %v884_v53  ;;  %v965_v13 = vunpack.c.0.s8 %v964_v39  ;;  %v1638_v53 = vlaneseq }
 0x2e5   :  { %v890_v21 = vrot.slane %v889_v7, 4  ;;  %v907_v35 = vadd.f32 %v906_v18, %v885_v36 }
 0x2e6   :  { %v899_v37 = vrot.slane %v898_v8, 4  ;;  %v916_v54 = vadd.f32 %v915_v2, %v886_v49  ;;  %v968_v46 = vsub.s32 %v965_v13, %v1637_v41  ;;  %vm988_vm1 = vcmp.lt.s32.totalorder %v1638_v53, 512 }
 0x2e7   :  { %v891_v29 = vadd.f32 %v890_v21, %v889_v7  ;;  %v908_v55 = vrot.slane %v907_v35, 4 }
 0x2e8   :  { %v900_v38 = vadd.f32 %v899_v37, %v898_v8  ;;  %v917_v20 = vrot.slane %v916_v54, 4 }
 0x2e9   :  { %v909_v22 = vadd.f32 %v908_v55, %v907_v35  ;;  %v892_v56 = vrot.slane %v891_v29, 2 }
 0x2ea   :  { %v918_v60 = vadd.f32 %v917_v20, %v916_v54  ;;  %v901_v24 = vrot.slane %v900_v38, 2 }
 0x2eb   :  { %v893_v58 = vadd.f32 %v892_v56, %v891_v29  ;;  %v910_v5 = vrot.slane %v909_v22, 2 }
 0x2ec   :  { %v902_v28 = vadd.f32 %v901_v24, %v900_v38  ;;  %v919_v4 = vrot.slane %v918_v60, 2 }
 0x2ed   :  { %v894_v17 = vrot.slane %v893_v58, 1  ;;  %v911_v9 = vadd.f32 %v910_v5, %v909_v22 }
 0x2ee   :  { %v903_v3 = vrot.slane %v902_v28, 1  ;;  %v920_v57 = vadd.f32 %v919_v4, %v918_v60 }
 0x2ef   :  { %v895_v61 = vadd.f32 %v894_v17, %v893_v58  ;;  %v912_v62 = vrot.slane %v911_v9, 1 }
 0x2f0   :  { %v904_v63 = vadd.f32 %v903_v3, %v902_v28  ;;  %v921_v11 = vrot.slane %v920_v57, 1 }
 0x2f1   :  { %v913_v14 = vadd.f32 %v912_v62, %v911_v9  ;;  %v929_v25 = vadd.f32 %v927_v6, %v895_v61 }
 0x2f2   :  { %v922_v12 = vadd.f32 %v921_v11, %v920_v57  ;;  %v930_v27 = vadd.f32 %v927_v6, %v904_v63 }
 0x2f3   :  { %v931_v15 = vadd.f32 %v927_v6, %v913_v14  ;;  %v1023_v26 = vmul.f32 -1.442695, %v929_v25 }
 0x2f4   :  { %v932_v30 = vadd.f32 %v927_v6, %v922_v12  ;;  %v1024_v31 = vmul.f32 -1.442695, %v930_v27 }
 0x2f5   :  { %1198 = vpow2.f32 %v1023_v26  ;;  %v1025_v40 = vmul.f32 -1.442695, %v931_v15 }
 0x2f6   :  { %1200 = vpow2.f32 %v1024_v31  ;;  %v1026_v50 = vmul.f32 -1.442695, %v932_v30 }
 0x2f7   :  { %1202 = vpow2.f32 %v1025_v40 }
 0x2f8   :  { %1204 = vpow2.f32 %v1026_v50 }
 0x2ff   :  { %v1199_v52 = vpop.eup %1198 }
 0x300   :  { %v1201_v59 = vpop.eup %1200  ;;  %v945_v42 = vadd.f32 1.0, %v1199_v52 }
 0x301   :  { %v1203_v19 = vpop.eup %1202  ;;  %v946_v23 = vadd.f32 1.0, %v1201_v59 }
 0x302   :  { %v1205_v0 = vpop.eup %1204  ;;  %v947_v1 = vadd.f32 1.0, %v1203_v19  ;;  %1206 = vrcp.f32 %v945_v42 }
 0x303   :  { %v948_v32 = vadd.f32 1.0, %v1205_v0  ;;  %1208 = vrcp.f32 %v946_v23 }
 0x304   :  { %1210 = vrcp.f32 %v947_v1 }
 0x305   :  { %1212 = vrcp.f32 %v948_v32 }
 0x30c   :  { %v1207_v43 = vpop.eup %1206 }
 0x30d   :  { %v1209_v10 = vpop.eup %1208 }
 0x30e   :  { %v1211_v47 = vpop.eup %1210  ;;  %v961_v48 = vcombine.low %v1207_v43, %v1209_v10 }
 0x30f   :  { %v1213_v33 = vpop.eup %1212 }
 0x310   :  { %v962_v44 = vcombine.low %v1211_v47, %v1213_v33  ;;  %v969_v45 = vrot.slane %v961_v48, %v968_v46 }
 0x312   :  { %v976_v18 = vrot.slane %v962_v44, %v968_v46 }
 0x314   :  { %v977_v34 = vcombine.low %v969_v45, %v976_v18 }
 0x316   :  { %v984_v2 = vrot.slane %v977_v34, %v968_v46 }
 0x318   :  { %990 = vst.msk [vmem:[#allocation7] sm:$0xf] %vm988_vm1, %v984_v2 }
 0x319   :  { %1269 = shalt.err (!%p1266_p6)
}
 0x31a   :  { %s1270_s12 = scalar_lea.hbm %s1612_s2, 64 }
 0x31b   :  { %p1271_p7 = scmp.ne.s32.totalorder %s1612_s2, %s1270_s12  ;;  %p1274_p8 = scmp.lt.u32.totalorder %s1270_s12, %s1612_s2 }
 0x31d   :  { %p1276_p9 = pnand %p1274_p8, %p1271_p7 }
 0x31f   :  { %1279 = shalt.err (!%p1276_p9)
}
 0x320   :  { %1000 = dma.vmem_to_hbm [thread:$0]  %s998_s8, 64, %s1612_s2, [#allocation4]  }
 0x321   :  { %1284 = dma.done.wait [#allocation4], 64  }
 0x322   :  { %1285 = vsyncadd [#allocation4], 4294967232 }
 0x323   :  { %1004 = vsyncpa [#allocation3], 1 }
 0x324   :  { %1005 = vsyncpa [#allocation6], 1 }
 0x325   :  { %1006 = vsyncpa [#allocation4], 1 }

</bundles_post_ra>
